<compile_context>
chip_gen: v6e
topology: v6e:2x2x1
jax: 0.10.0
libtpu: 0.0.40
codegen_flags: <defaults>
</compile_context>

<pallas_src>
import functools

import jax
import jax.numpy as jnp
from jax.experimental import pallas as pl
from jax.experimental.pallas import tpu as pltpu

_LANE = 128
_ROW_BLK = 128      # prediction rows per inner micro-tile
_LANE_BLK = 256     # gt columns per MXU call (folded as 2 x 128-lane minimums)
_TN_MAX = 1024      # prediction-point tile (sublane axis of the distance tile)
_TM_MAX = 2048      # ground-truth-point tile (lane axis of the distance tile)
_BIG = 1e30         # finite sentinel for padded gt columns (no inf through MXU)


def _half_cd_kernel(pa_ref, ga_ref, o_ref, acc_ref, *, tn: int, tm: int, d: int):
    # pa_ref:  (1, TN, D+1)  augmented prediction tile [-2*p | 1]
    # ga_ref:  (1, D+1, TM)  augmented gt tile [g ; ||g||^2], pre-transposed
    # o_ref:   (1, 1, TN)    per-prediction-point min squared distance (lane-dense)
    # acc_ref: (TN, 128)     running-min accumulator (f32 VMEM scratch)
    m = pl.program_id(2)

    @pl.when(m == 0)
    def _init():
        acc_ref[...] = jnp.full_like(acc_ref, _BIG)

    # Chunked matmul-then-min: each (128, 256) MXU result block is consumed by
    # two VPU minimums while register-resident; the full (TN, TM) distance tile
    # never exists.
    for r in range(tn // _ROW_BLK):
        p_blk = pa_ref[0, pl.ds(r * _ROW_BLK, _ROW_BLK), :]            # (128, D+1)
        acc = acc_ref[pl.ds(r * _ROW_BLK, _ROW_BLK), :]                # (128, 128)
        for c in range(tm // _LANE_BLK):
            g_blk = ga_ref[0, :, pl.ds(c * _LANE_BLK, _LANE_BLK)]      # (D+1, 256)
            # chunk[i, j] = -2 p_i . g_j + ||g_j||^2   (gsq fused via ones column)
            chunk = jnp.dot(p_blk, g_blk, preferred_element_type=jnp.float32)
            acc = jnp.minimum(acc, chunk[:, :_LANE])
            acc = jnp.minimum(acc, chunk[:, _LANE:])
        acc_ref[pl.ds(r * _ROW_BLK, _ROW_BLK), :] = acc

    @pl.when(m == pl.num_programs(2) - 1)
    def _finalize():
        pa = pa_ref[0].astype(jnp.float32)                 # (TN, D+1) = [-2p | 1]
        coords = pa[:, :d]                                 # exclude the ones column
        p_sq = 0.25 * jnp.sum(coords * coords, axis=-1)    # (TN,)  == ||p||^2 exactly
        row_min = jnp.min(acc_ref[...], axis=-1)           # single cross-lane min
        d_x = jnp.maximum(row_min + p_sq, 0.0)             # clamp after the min
        o_ref[...] = d_x.reshape(1, 1, -1)


def _choose_n_tile(n: int, b: int):
    n128 = -(-n // 128)                      # number of 128-row groups
    gmax = _TN_MAX // 128
    if b == 1 and n128 >= 2:
        # v7x has 2 TensorCores: keep >= 2 units of "parallel" grid work.
        gmax = min(gmax, max(1, n128 // 2))
    g = min(gmax, n128)
    tn = 128 * g
    n_pad = tn * (-(-n // tn))
    return tn, n_pad


def _choose_m_tile(m: int):
    m256 = -(-m // 256)
    g = min(_TM_MAX // 256, m256)
    tm = 256 * g
    m_pad = tm * (-(-m // tm))
    return tm, m_pad


def half_cd_loss(prediction: jax.Array, ground_truth: jax.Array) -> jax.Array:
    """One-sided (half) Chamfer distance: prediction (B,N,D), ground_truth (B,M,D) -> (B,)."""
    B, N, D = prediction.shape
    Bg, M, Dg = ground_truth.shape
    assert B == Bg and D == Dg

    tn, n_pad = _choose_n_tile(N, B)
    tm, m_pad = _choose_m_tile(M)

    pred = prediction.astype(jnp.float32)
    gt = ground_truth.astype(jnp.float32)

    # Augmented LHS [-2*p | 1]: the ones column picks up the ||g||^2 row of the
    # RHS so the MXU produces  -2 p.g + ||g||^2  directly.
    pa = jnp.concatenate([-2.0 * pred, jnp.ones((B, N, 1), jnp.float32)], axis=-1)
    pa = jnp.pad(pa, ((0, 0), (0, n_pad - N), (0, 0)))                # (B, N_pad, D+1)

    # Augmented, pre-transposed RHS [g ; ||g||^2]; padded gt columns get a large
    # finite sentinel in the ||g||^2 row (their coordinate rows stay 0).
    gsq = jnp.sum(gt * gt, axis=-1, keepdims=True)                    # (B, M, 1)
    ga = jnp.swapaxes(jnp.concatenate([gt, gsq], axis=-1), 1, 2)      # (B, D+1, M)
    ga = jnp.pad(ga, ((0, 0), (0, 0), (0, m_pad - M)))                # (B, D+1, M_pad)
    ga = ga.at[:, D, M:].set(_BIG)

    grid = (B, n_pad // tn, m_pad // tm)
    kernel = functools.partial(_half_cd_kernel, tn=tn, tm=tm, d=D)

    n_tiles = n_pad // tn
    cost = pl.CostEstimate(
        flops=int(2 * B * n_pad * m_pad * (D + 1) + B * n_pad * m_pad),
        transcendentals=0,
        bytes_accessed=int(
            B * n_pad * (D + 1) * 4              # prediction tiles (once per N tile)
            + B * (D + 1) * m_pad * 4 * n_tiles  # gt tiles re-read once per N tile
            + B * n_pad * 4                      # per-point output
        ),
    )

    d_x = pl.pallas_call(
        kernel,
        out_shape=jax.ShapeDtypeStruct((B, 1, n_pad), jnp.float32),
        grid_spec=pltpu.PrefetchScalarGridSpec(
            num_scalar_prefetch=0,
            grid=grid,
            in_specs=[
                pl.BlockSpec((1, tn, D + 1), lambda b, n, m: (b, n, 0)),
                pl.BlockSpec((1, D + 1, tm), lambda b, n, m: (b, 0, m)),
            ],
            out_specs=pl.BlockSpec((1, 1, tn), lambda b, n, m: (b, 0, n)),
            scratch_shapes=[pltpu.VMEM((tn, _LANE), jnp.float32)],
        ),
        compiler_params=pltpu.CompilerParams(
            dimension_semantics=("parallel", "parallel", "arbitrary"),
            # Working set is ~2 MiB; set the scoped-VMEM limit explicitly so the
            # enlarged tiles stay safe under v5e's smaller default.
            vmem_limit_bytes=32 * 1024 * 1024,
        ),
        cost_estimate=cost,
    )(pa, ga)

    # Sum over the logical N only (drop padded rows); divide by the true N.
    return jnp.sum(d_x[:, 0, :N], axis=-1) / N


def _reference(prediction, ground_truth):
    # Pure-JAX reference with identical semantics to the torch module.
    diff = prediction[:, :, None, :] - ground_truth[:, None, :, :]   # (B, N, M, D)
    d2 = jnp.sum(diff * diff, axis=-1)                               # (B, N, M)
    d_x = jnp.min(d2, axis=-1)                                       # (B, N)
    return jnp.sum(d_x, axis=-1) / d2.shape[-2]                      # (B,)


if __name__ == "__main__":
    key = jax.random.PRNGKey(0)
    k1, k2, k3, k4, k5, k6 = jax.random.split(key, 6)

    # Small case (single tile on each axis).
    B, N, M, D = 2, 16, 8, 32
    prediction = jax.random.normal(k1, (B, N, D), dtype=jnp.float32)
    ground_truth = jax.random.normal(k2, (B, M, D), dtype=jnp.float32)
    out = half_cd_loss(prediction, ground_truth)
    jax.block_until_ready(out)
    ref = _reference(prediction, ground_truth)
    assert out.shape == (B,)
    assert jnp.allclose(out, ref, rtol=1e-4, atol=1e-4), (out, ref)

    # Larger case exercising multi-chunk inner loops, padding and masking (3-D clouds).
    B2, N2, M2, D2 = 2, 300, 650, 3
    pred2 = jax.random.normal(k3, (B2, N2, D2), dtype=jnp.float32)
    gt2 = jax.random.normal(k4, (B2, M2, D2), dtype=jnp.float32)
    out2 = half_cd_loss(pred2, gt2)
    jax.block_until_ready(out2)
    ref2 = _reference(pred2, gt2)
    assert out2.shape == (B2,)
    assert jnp.allclose(out2, ref2, rtol=1e-4, atol=1e-4), (out2, ref2)

    # B == 1 path: N tile is capped so the grid still has >= 2 parallel units.
    B3, N3, M3, D3 = 1, 300, 130, 3
    pred3 = jax.random.normal(k5, (B3, N3, D3), dtype=jnp.float32)
    gt3 = jax.random.normal(k6, (B3, M3, D3), dtype=jnp.float32)
    out3 = half_cd_loss(pred3, gt3)
    jax.block_until_ready(out3)
    ref3 = _reference(pred3, gt3)
    assert out3.shape == (B3,)
    assert jnp.allclose(out3, ref3, rtol=1e-4, atol=1e-4), (out3, ref3)

    print("KERNEL_OK")
</pallas_src>

<mosaic_0001>
module attributes {stable_mosaic.version = 11 : i64} {
  func.func @_half_cd_kernel(%arg0: i32, %arg1: i32, %arg2: i32, %arg3: memref<1x128x33xf32, #tpu.memory_space<vmem>>, %arg4: memref<1x33x256xf32, #tpu.memory_space<vmem>>, %arg5: memref<1x1x128xf32, #tpu.memory_space<vmem>>, %arg6: memref<128x128xf32, #tpu.memory_space<vmem>>) attributes {dimension_semantics = [#tpu.dimension_semantics<parallel>, #tpu.dimension_semantics<parallel>, #tpu.dimension_semantics<arbitrary>], iteration_bounds = array<i64: 2, 1, 1>, scalar_prefetch = 0 : i64, scratch_operands = 1 : i64, tpu.core_type = #tpu.core_type<tc>, window_params = [{transform_indices = @transform_0, window_bounds = array<i64: 1, 128, 33>}, {transform_indices = @transform_1, window_bounds = array<i64: 1, 33, 256>}, {transform_indices = @transform_2, window_bounds = array<i64: 1, 1, 128>}]} {
    %c0_i32 = arith.constant 0 : i32
    %0 = arith.cmpi eq, %arg2, %c0_i32 : i32
    %1 = arith.extui %0 : i1 to i32
    %c0_i32_0 = arith.constant 0 : i32
    %2 = arith.cmpi ne, %1, %c0_i32_0 : i32
    scf.if %2 {
      %cst_12 = arith.constant 1.000000e+30 : f32
      %17 = vector.broadcast %cst_12 : f32 to vector<128x128xf32>
      %c0_13 = arith.constant 0 : index
      %c0_14 = arith.constant 0 : index
      %18 = vector.load %arg6[%c0_13, %c0_14] : memref<128x128xf32, #tpu.memory_space<vmem>>, vector<128x128xf32>
      tpu.vector_store %arg6[%c0_13, %c0_14], %17 {strides = array<i32>} : memref<128x128xf32, #tpu.memory_space<vmem>>, vector<128x128xf32>,
    } else {
    }
    %c0 = arith.constant 0 : index
    %c0_1 = arith.constant 0 : index
    %c0_2 = arith.constant 0 : index
    %3 = vector.load %arg3[%c0, %c0_1, %c0_2] : memref<1x128x33xf32, #tpu.memory_space<vmem>>, vector<1x128x33xf32>
    %4 = vector.shape_cast %3 : vector<1x128x33xf32> to vector<128x33xf32>
    %c0_3 = arith.constant 0 : index
    %c0_4 = arith.constant 0 : index
    %5 = vector.load %arg6[%c0_3, %c0_4] : memref<128x128xf32, #tpu.memory_space<vmem>>, vector<128x128xf32>
    %c0_5 = arith.constant 0 : index
    %c0_6 = arith.constant 0 : index
    %c0_7 = arith.constant 0 : index
    %6 = vector.load %arg4[%c0_5, %c0_6, %c0_7] : memref<1x33x256xf32, #tpu.memory_space<vmem>>, vector<1x33x256xf32>
    %7 = vector.shape_cast %6 : vector<1x33x256xf32> to vector<33x256xf32>
    %cst = arith.constant dense<0.000000e+00> : vector<128x256xf32>
    %8 = tpu.matmul %4, %7, %cst {dimension_numbers = #tpu.dot_dimension_numbers<[1], [0], [0], [1], [0, 0, 1, 1], [], []>} : vector<128x33xf32>, vector<33x256xf32>, vector<128x256xf32> -> vector<128x256xf32>
    %9 = vector.extract_strided_slice %8 {offsets = [0, 0], sizes = [128, 128], strides = [1, 1]} : vector<128x256xf32> to vector<128x128xf32>
    %10 = arith.minimumf %5, %9 : vector<128x128xf32>
    %11 = vector.extract_strided_slice %8 {offsets = [0, 128], sizes = [128, 128], strides = [1, 1]} : vector<128x256xf32> to vector<128x128xf32>
    %12 = arith.minimumf %10, %11 : vector<128x128xf32>
    %c0_8 = arith.constant 0 : index
    %c0_9 = arith.constant 0 : index
    %13 = vector.load %arg6[%c0_8, %c0_9] : memref<128x128xf32, #tpu.memory_space<vmem>>, vector<128x128xf32>
    tpu.vector_store %arg6[%c0_8, %c0_9], %12 {strides = array<i32>} : memref<128x128xf32, #tpu.memory_space<vmem>>, vector<128x128xf32>,
    %c0_i32_10 = arith.constant 0 : i32
    %14 = arith.cmpi eq, %arg2, %c0_i32_10 : i32
    %15 = arith.extui %14 : i1 to i32
    %c0_i32_11 = arith.constant 0 : i32
    %16 = arith.cmpi ne, %15, %c0_i32_11 : i32
    scf.if %16 {
      %c0_12 = arith.constant 0 : index
      %c0_13 = arith.constant 0 : index
      %c0_14 = arith.constant 0 : index
      %17 = vector.load %arg3[%c0_12, %c0_13, %c0_14] : memref<1x128x33xf32, #tpu.memory_space<vmem>>, vector<1x128x33xf32>
      %18 = vector.shape_cast %17 : vector<1x128x33xf32> to vector<128x33xf32>
      %19 = vector.extract_strided_slice %18 {offsets = [0, 0], sizes = [128, 32], strides = [1, 1]} : vector<128x33xf32> to vector<128x32xf32>
      %20 = arith.mulf %19, %19 : vector<128x32xf32>
      %cst_15 = arith.constant dense<0.000000e+00> : vector<128xf32>
      %21 = vector.multi_reduction <add>, %20, %cst_15 [1] : vector<128x32xf32> to vector<128xf32>
      %cst_16 = arith.constant 2.500000e-01 : f32
      %22 = vector.broadcast %cst_16 : f32 to vector<128xf32>
      %23 = arith.mulf %22, %21 : vector<128xf32>
      %c0_17 = arith.constant 0 : index
      %c0_18 = arith.constant 0 : index
      %24 = vector.load %arg6[%c0_17, %c0_18] : memref<128x128xf32, #tpu.memory_space<vmem>>, vector<128x128xf32>
      %cst_19 = arith.constant dense<0x7F800000> : vector<128xf32>
      %25 = vector.multi_reduction <minimumf>, %24, %cst_19 [1] : vector<128x128xf32> to vector<128xf32>
      %26 = arith.addf %25, %23 : vector<128xf32>
      %cst_20 = arith.constant 0.000000e+00 : f32
      %27 = vector.broadcast %cst_20 : f32 to vector<128xf32>
      %28 = arith.maximumf %26, %27 : vector<128xf32>
      %29 = vector.shape_cast %28 : vector<128xf32> to vector<1x1x128xf32>
      %c0_21 = arith.constant 0 : index
      %c0_22 = arith.constant 0 : index
      %c0_23 = arith.constant 0 : index
      %30 = vector.load %arg5[%c0_21, %c0_22, %c0_23] : memref<1x1x128xf32, #tpu.memory_space<vmem>>, vector<1x1x128xf32>
      tpu.vector_store %arg5[%c0_21, %c0_22, %c0_23], %29 {strides = array<i32>} : memref<1x1x128xf32, #tpu.memory_space<vmem>>, vector<1x1x128xf32>,
    } else {
    }
    return
  }
  func.func @transform_0(%arg0: i32, %arg1: i32, %arg2: i32) -> (i32, i32, i32) {
    %c0_i32 = arith.constant 0 : i32
    %c0_i32_0 = arith.constant 0 : i32
    return %arg0, %arg1, %c0_i32 : i32, i32, i32
  }
  func.func @transform_1(%arg0: i32, %arg1: i32, %arg2: i32) -> (i32, i32, i32) {
    %c0_i32 = arith.constant 0 : i32
    %c0_i32_0 = arith.constant 0 : i32
    return %arg0, %c0_i32, %arg2 : i32, i32, i32
  }
  func.func @transform_2(%arg0: i32, %arg1: i32, %arg2: i32) -> (i32, i32, i32) {
    %c0_i32 = arith.constant 0 : i32
    %c0_i32_0 = arith.constant 0 : i32
    return %arg0, %c0_i32, %arg1 : i32, i32, i32
  }
}

</mosaic_0001>

<bundles_post_ra>
// kernel: tpu_custom_call.1
= control target key start
LH: loop header
LB: loop body
LE: loop exit
PB: predicated region body
PF: predicated region fallthrough
CT: control target
= control target key end

     0   :  { %7 = vsyncpa [#allocation4], 0  ;;  %s1436_s0 = inlined_call_operand.vmem [shape: f32[2,128,33], index: 0, kind: input, shape index: {}]   ;;  %s1437_s1 = inlined_call_operand.vmem [shape: f32[2,33,256], index: 1, kind: input, shape index: {}]   ;;  %s1438_s2 = inlined_call_operand.hbm [shape: f32[2,1,128], index: 2, kind: output, shape index: {}]  }
   0x1   :  { %9 = vsyncpa [#allocation4 + $0x1], 0  ;;  %s1147_s9 = smov 0   ;;  %s1149_s10 = smov 0  }
   0x2   :  { %s1151_s11 = smov 0   ;;  %s1153_s12 = smov 0  }
   0x3   :  { %s1155_s13 = smov 0   ;;  %s1157_s14 = smov 0  }
   0x4 LB: > { %s955_s15 = sadd.s32 4294967295, %s1128_s14   ;;  %s956_s16 = sadd.s32 4294967294, %s1128_s14   ;;  %s1128_s14 = sphi %s1157_s14, %s15_s14   ;;  %s1124_s13 = sphi %s1155_s13, %s1445_s13   ;;  %s1120_s12 = sphi %s1153_s12, %s1444_s12   ;;  %s1116_s11 = sphi %s1151_s11, %s1443_s11   ;;  %s1112_s10 = sphi %s1149_s10, %s1442_s10   ;;  %s1108_s9 = sphi %s1147_s9, %s1441_s9  }
   0x5   : > { %s34_s17 = sadd.s32 1, %s1124_s13  ;;  %s99_s18 = sadd.s32 1, %s1116_s11 }
   0x6   : > { %p36_p0 = scmp.ge.s32.totalorder %s34_s17, 2  ;;  %p109_p1 = scmp.ne.s32.totalorder %s1116_s11, %s1112_s10 }
   0x7   : > { %p110_p2 = scmp.eq.s32.totalorder %s955_s15, 1  ;;  %p115_p3 = scmp.ne.s32.totalorder %s1112_s10, %s1108_s9 }
   0x8   : > { %s1447_s17 = smov (%p36_p0, %s34_s17), 0  ;;  %p116_p5 = scmp.eq.s32.totalorder %s956_s16, 1 }
   0x9   : > { %p1187_p4 = por %p110_p2, %p109_p1  ;;  %s94_s20 = ssub.s32 %s1124_s13, %s1447_s17 }
   0xa   : > { %p959_p6 = scmp.ge.s32.totalorder %s1128_s14, 1  ;;  %p97_p7 = scmp.eq.s32.totalorder %s94_s20, 0 }
   0xb   : > { %p1194_p8 = por %p116_p5, %p115_p3  ;;  %p160_p9 = scmp.lt.s32.totalorder %s1128_s14, 3 }
   0xc   : > { %s1200_s22 = scalar_select %p97_p7, %s1116_s11, %s99_s18  }
   0xd   : > { %p161_p10 = pnand %p959_p6, %p160_p9 }
   0xe   : > { %p195_p11 = scmp.lt.s32.totalorder (!%p161_p10), %s1120_s12, 1  ;;  %s192_s4 = sand.u32 (!%p161_p10), 1, %s1112_s10  }
   0xf   : > { %164 = sbr.rel (%p161_p10) target bundleno = 443 (0x1bb), region = 28  ;;  %s981_s5 = sshll.u32 (!%p161_p10), %s1120_s12, 4 }
  0x10   : > { %s193_s6 = scalar_lea.vmem (!%p161_p10), [#allocation3], %s192_s4  ;;  %s1394_s16 = scalar_lea.hbm (!%p161_p10), %s1438_s2, %s981_s5 }
  0x11   : > { %s864_s7 = sshll.u32 (!%p161_p10), %s193_s6, 4  ;;  %s1131_s20 = smov (!%p161_p10), [#allocation3]   ;;  %s865_s7 = int_to_ptr.vmem [resolvable:$true] %s864_s7 }
  0x12   : > { %s1052_s18 = scalar_lea.vmem (!%p161_p10), %s865_s7, 16 }
  0x13   : > { %p1053_p12 = scmp.ne.s32.totalorder (!%p161_p10), %s865_s7, %s1052_s18 }
  0x14   : > { %v1130_v0 = vmov 0.0   ;;  %s196_s23 = scalar_select %p195_p11, %s1120_s12, 1  ;;  %vm325_vm0 = vcmask 1040384   ;;  %vm576_vm1 = vcmask 261120   ;;  %vm276_vm2 = vcmask 269312  }
  0x15   : > { %396 = vmatprep.mubr.f32.mxu0 %v1130_v0  ;;  %444 = vmatprep.mubr.f32.mxu1 %v1130_v0  ;;  %vm748_vm3 = vcmask 130112   ;;  %vm755_vm4 = vcmask 195712   ;;  %vm762_vm5 = vcmask 261312   ;;  %vm769_vm6 = vcmask 326912   ;;  %s851_s12 = scalar_lea.sflag [#allocation4], %s192_s4  ;;  %p1054_p13 = pnand %p1053_p12, %p1187_p4 }
  0x16   : > { %s995_s24 = smul.u32 80, %s196_s23  ;;  %s984_s25 = sshll.u32 %s196_s23, 7  ;;  %vm776_vm7 = vcmask 392512   ;;  %vm783_vm8 = vcmask 458112   ;;  %vm790_vm9 = vcmask 523712   ;;  %vm797_vm10 = vcmask 589312  }
  0x17   : > { %s1212_s3 = scalar_lea.vmem %s1436_s0, %s984_s25  ;;  %vm804_vm11 = vcmask 654912   ;;  %vm811_vm12 = vcmask 720512   ;;  %vm818_vm13 = vcmask 786112   ;;  %vm825_vm14 = vcmask 851712   ;;  %p1055_p0 = pneg %p1054_p13 }
  0x18   : > { %s212_s28 = scalar_lea.vmem %s1437_s1, %s995_s24  ;;  %v234_v9 = vld [vmem:[%s1212_s3] sm:$0xff]  ;;  %v236_v10 = vld [vmem:[%s1212_s3 + $0x10] sm:$0xff]  ;;  %v235_v16 = vld [vmem:[%s1212_s3 + $0x8] sm:$0xff]  ;;  %vm832_vm15 = vcmask 917312   ;;  %s1056_s23 = sshll.u32 %s1131_s20, 4  ;;  %s1057_s23 = int_to_ptr.vmem [resolvable:$false] %s1056_s23 }
  0x19   : > { %v275_v1 = vld [vmem:[%s212_s28 + $0x48] sm:$0x1]  ;;  %v274_v2 = vld [vmem:[%s212_s28 + $0x40] sm:$0x1]  ;;  %v273_v3 = vld [vmem:[%s212_s28 + $0x38] sm:$0xff]  ;;  %v560_v12 = vmul.f32 %v234_v9, %v234_v9  ;;  %v562_v13 = vmul.f32 %v236_v10, %v236_v10  ;;  %v561_v18 = vmul.f32 %v235_v16, %v235_v16  ;;  %s1058_s24 = scalar_lea.vmem %s1057_s23, 32  ;;  %p1059_p1 = scmp.lt.s32.totalorder %s865_s7, %s1057_s23 }
  0x1a   : > { %963 = vmatprep.subr.msk.mxu0 %vm325_vm0, %v275_v1  ;;  %985 = vmatprep.subr.msk.mxu1 %vm325_vm0, %v275_v1  ;;  %v272_v4 = vld [vmem:[%s212_s28 + $0x30] sm:$0xff]  ;;  %v271_v5 = vld [vmem:[%s212_s28 + $0x28] sm:$0xff]  ;;  %v270_v6 = vld [vmem:[%s212_s28 + $0x20] sm:$0xff]  ;;  %p1060_p2 = scmp.lt.s32.totalorder %s1058_s24, %s1052_s18 }
  0x1b   : > { %964 = vmatpush1.msk.msra.mxu0 %vm325_vm0, %v274_v2  ;;  %990 = vmatpush1.msk.msra.mxu1 %vm325_vm0, %v274_v2  ;;  %v269_v7 = vld [vmem:[%s212_s28 + $0x18] sm:$0xff]  ;;  %v268_v8 = vld [vmem:[%s212_s28 + $0x10] sm:$0xff]  ;;  %v267_v11 = vld [vmem:[%s212_s28 + $0x8] sm:$0xff]  ;;  %v577_v17 = vsel %vm576_vm1, %v560_v12, 0.0  ;;  %v583_v19 = vsel %vm576_vm1, %v562_v13, 0.0  ;;  %v580_v22 = vsel %vm576_vm1, %v561_v18, 0.0 }
  0x1c   : > { %356 = vmatprep.subr.mxu0 %v273_v3  ;;  %986 = vmatprep.subr.mxu1 %v273_v3  ;;  %v266_v14 = vld [vmem:[%s212_s28] sm:$0xff]  ;;  %v243_v20 = vld [vmem:[%s1212_s3 + $0x48] sm:$0xff]  ;;  %v244_v24 = vld [vmem:[%s1212_s3 + $0x50] sm:$0xff]  ;;  %vm839_vm0 = vcmask 982912   ;;  %p1061_p3 = por %p1060_p2, %p1059_p1 }
  0x1d   : > { %357 = vmatpush1.msra.mxu0 %v272_v4  ;;  %991 = vmatpush1.msra.mxu1 %v272_v4  ;;  %v242_v15 = vld [vmem:[%s1212_s3 + $0x40] sm:$0xff]  ;;  %v239_v25 = vld [vmem:[%s1212_s3 + $0x28] sm:$0xff]  ;;  %v237_v28 = vld [vmem:[%s1212_s3 + $0x18] sm:$0xff]  ;;  %v569_v42 = vmul.f32 %v243_v20, %v243_v20  ;;  %v570_v45 = vmul.f32 %v244_v24, %v244_v24 }
  0x1e   : > { %358 = vmatprep.subr.mxu0 %v271_v5  ;;  %987 = vmatprep.subr.mxu1 %v271_v5  ;;  %v238_v21 = vld [vmem:[%s1212_s3 + $0x20] sm:$0xff]  ;;  %v565_v27 = vmul.f32 %v239_v25, %v239_v25  ;;  %v245_v29 = vld [vmem:[%s1212_s3 + $0x58] sm:$0xff]  ;;  %v240_v30 = vld [vmem:[%s1212_s3 + $0x30] sm:$0xff]  ;;  %v568_v39 = vmul.f32 %v242_v15, %v242_v15  ;;  %v563_v49 = vmul.f32 %v237_v28, %v237_v28  ;;  %p1062_p5 = pnand %p1061_p3, %p1055_p0 }
  0x1f   : > { %359 = vmatpush1.msra.mxu0 %v270_v6  ;;  %992 = vmatpush1.msra.mxu1 %v270_v6  ;;  %v564_v23 = vmul.f32 %v238_v21, %v238_v21  ;;  %v566_v32 = vmul.f32 %v240_v30, %v240_v30  ;;  %v246_v33 = vld [vmem:[%s1212_s3 + $0x60] sm:$0xff]  ;;  %v241_v34 = vld [vmem:[%s1212_s3 + $0x38] sm:$0xff]  ;;  %v247_v37 = vld [vmem:[%s1212_s3 + $0x68] sm:$0xff]  ;;  %v604_v44 = vsel %vm576_vm1, %v569_v42, 0.0  ;;  %v607_v46 = vsel %vm576_vm1, %v570_v45, 0.0 }
  0x20   : > { %360 = vmatprep.subr.mxu0 %v269_v7  ;;  %988 = vmatprep.subr.mxu1 %v269_v7  ;;  %v592_v31 = vsel %vm576_vm1, %v565_v27, 0.0  ;;  %v567_v36 = vmul.f32 %v241_v34, %v241_v34  ;;  %v248_v40 = vld [vmem:[%s1212_s3 + $0x70] sm:$0xff]  ;;  %v601_v41 = vsel %vm576_vm1, %v568_v39, 0.0  ;;  %v249_v43 = vld [vmem:[%s1212_s3 + $0x78] sm:$0xff]  ;;  %v571_v47 = vmul.f32 %v245_v29, %v245_v29 }
  0x21   : > { %361 = vmatpush1.msra.mxu0 %v268_v8  ;;  %993 = vmatpush1.msra.mxu1 %v268_v8  ;;  %v589_v26 = vsel %vm576_vm1, %v564_v23, 0.0  ;;  %v595_v35 = vsel %vm576_vm1, %v566_v32, 0.0  ;;  %v572_v50 = vmul.f32 %v246_v33, %v246_v33  ;;  %v586_v51 = vsel %vm576_vm1, %v563_v49, 0.0 }
  0x22   : > { %362 = vmatprep.subr.mxu0 %v267_v11  ;;  %989 = vmatprep.subr.mxu1 %v267_v11  ;;  %v598_v38 = vsel %vm576_vm1, %v567_v36, 0.0  ;;  %v610_v48 = vsel %vm576_vm1, %v571_v47, 0.0  ;;  %v573_v59 = vmul.f32 %v247_v37, %v247_v37  ;;  %v574_v4 = vmul.f32 %v248_v40, %v248_v40 }
  0x23   : > { %363 = vmatpush1.msra.mxu0 %v266_v14  ;;  %994 = vmatpush1.msra.mxu1 %v266_v14  ;;  %v613_v52 = vsel %vm576_vm1, %v572_v50, 0.0  ;;  %v575_v12 = vmul.f32 %v249_v43, %v249_v43 }
  0x24   : > { %965 = vmatmul.mubr.msk.f32.vlgmr.msra.gmra.mxu0 %vm276_vm2, %v234_v9  ;;  %973 = vmatmul.mubr.msk.f32.vlgmr.msra.gmra.mxu1 %vm276_vm2, %v242_v15  ;;  %v616_v3 = vsel %vm576_vm1, %v573_v59, 0.0  ;;  %v619_v11 = vsel %vm576_vm1, %v574_v4, 0.0 }
  0x25   : > { %402 = vmatprep.mubr.f32.mxu0 %v1130_v0  ;;  %450 = vmatprep.mubr.f32.mxu1 %v1130_v0  ;;  %v622_v18 = vsel %vm576_vm1, %v575_v12, 0.0  ;;  %vm846_vm1 = vcmask 1048512  }
  0x26   : > { %578 = vadd.xlane.f32.xlu0 %v577_v17  ;;  %584 = vadd.xlane.f32.xlu1 %v583_v19 }
  0x28   : > { %966 = vmatmul.mubr.msk.f32.gmra.mxu0 %vm276_vm2, %v235_v16  ;;  %974 = vmatmul.mubr.msk.f32.gmra.mxu1 %vm276_vm2, %v243_v20 }
  0x29   : > { %408 = vmatprep.mubr.f32.mxu0 %v1130_v0  ;;  %456 = vmatprep.mubr.f32.mxu1 %v1130_v0 }
  0x2a   : > { %581 = vadd.xlane.f32.xlu0 %v580_v22  ;;  %587 = vadd.xlane.f32.xlu1 %v586_v51 }
  0x2c   : > { %967 = vmatmul.mubr.msk.f32.gmra.mxu0 %vm276_vm2, %v236_v10  ;;  %975 = vmatmul.mubr.msk.f32.gmra.mxu1 %vm276_vm2, %v244_v24 }
  0x2d   : > { %414 = vmatprep.mubr.f32.mxu0 %v1130_v0  ;;  %462 = vmatprep.mubr.f32.mxu1 %v1130_v0 }
  0x2e   : > { %590 = vadd.xlane.f32.xlu0 %v589_v26 }
  0x30   : > { %968 = vmatmul.mubr.msk.f32.gmra.mxu0 %vm276_vm2, %v237_v28  ;;  %976 = vmatmul.mubr.msk.f32.gmra.mxu1 %vm276_vm2, %v245_v29 }
  0x31   : > { %420 = vmatprep.mubr.f32.mxu0 %v1130_v0  ;;  %468 = vmatprep.mubr.f32.mxu1 %v1130_v0 }
  0x32   : > { %593 = vadd.xlane.f32.xlu0 %v592_v31 }
  0x34   : > { %969 = vmatmul.mubr.msk.f32.gmra.mxu0 %vm276_vm2, %v238_v21  ;;  %977 = vmatmul.mubr.msk.f32.gmra.mxu1 %vm276_vm2, %v246_v33 }
  0x35   : > { %426 = vmatprep.mubr.f32.mxu0 %v1130_v0  ;;  %474 = vmatprep.mubr.f32.mxu1 %v1130_v0 }
  0x36   : > { %596 = vadd.xlane.f32.xlu0 %v595_v35 }
  0x38   : > { %970 = vmatmul.mubr.msk.f32.gmra.mxu0 %vm276_vm2, %v239_v25  ;;  %978 = vmatmul.mubr.msk.f32.gmra.mxu1 %vm276_vm2, %v247_v37 }
  0x39   : > { %432 = vmatprep.mubr.f32.mxu0 %v1130_v0  ;;  %480 = vmatprep.mubr.f32.mxu1 %v1130_v0 }
  0x3a   : > { %599 = vadd.xlane.f32.xlu0 %v598_v38 }
  0x3c   : > { %971 = vmatmul.mubr.msk.f32.gmra.mxu0 %vm276_vm2, %v240_v30  ;;  %979 = vmatmul.mubr.msk.f32.gmra.mxu1 %vm276_vm2, %v248_v40 }
  0x3d   : > { %438 = vmatprep.mubr.f32.mxu0 %v1130_v0  ;;  %486 = vmatprep.mubr.f32.mxu1 %v1130_v0 }
  0x3e   : > { %602 = vadd.xlane.f32.xlu0 %v601_v41 }
  0x40   : > { %972 = vmatmul.mubr.msk.f32.gmra.mxu0 %vm276_vm2, %v241_v34  ;;  %980 = vmatmul.mubr.msk.f32.gmra.mxu1 %vm276_vm2, %v249_v43 }
  0x42   : > { %605 = vadd.xlane.f32.xlu0 %v604_v44 }
  0x46   : > { %608 = vadd.xlane.f32.xlu0 %v607_v46 }
  0x4a   : > { %611 = vadd.xlane.f32.xlu0 %v610_v48 }
  0x4e   : > { %614 = vadd.xlane.f32.xlu0 %v613_v52 }
  0xaf   : > { %v579_v59 = vpop.xlane.xlu0 %578 }
  0xe4   : > { %v398_v53 = vpop.f32.mrf.mxu0  ;;  %v446_v54 = vpop.f32.mrf.mxu1 }
  0xe5   : > { %v493_v55 = vmin.f32 %v398_v53, 1e+30  ;;  %v501_v56 = vmin.f32 %v446_v54, 1e+30 }
  0xe6   : > { %v400_v57 = vpop.f32.mrf.mxu0  ;;  %v448_v58 = vpop.f32.mrf.mxu1 }
  0xe7   : > { %v509_v60 = vmin.f32 %v493_v55, %v400_v57  ;;  %v517_v61 = vmin.f32 %v501_v56, %v448_v58 }
  0xe8   : > { %v404_v62 = vpop.f32.mrf.mxu0  ;;  %v452_v63 = vpop.f32.mrf.mxu1 }
  0xe9   : > { %v494_v0 = vmin.f32 %v404_v62, 1e+30  ;;  %673 = vmin.xlane.f32.xlu1 %v517_v61  ;;  %657 = vmin.xlane.f32.xlu0 %v509_v60  ;;  %v502_v6 = vmin.f32 %v452_v63, 1e+30  ;;  %v582_v60 = vpop.xlane.xlu0 %581 }
  0xea   : > { %v406_v1 = vpop.f32.mrf.mxu0  ;;  %v454_v2 = vpop.f32.mrf.mxu1 }
  0xeb   : > { %v510_v5 = vmin.f32 %v494_v0, %v406_v1  ;;  %v518_v13 = vmin.f32 %v502_v6, %v454_v2  ;;  %v585_v1 = vpop.xlane.xlu1 %584 }
  0xec   : > { %v410_v7 = vpop.f32.mrf.mxu0  ;;  %v458_v8 = vpop.f32.mrf.mxu1 }
  0xed   : > { %659 = vmin.xlane.f32.xlu1 %v510_v5  ;;  %617 = vadd.xlane.f32.xlu0 %v616_v3  ;;  %v495_v14 = vmin.f32 %v410_v7, 1e+30  ;;  %v503_v20 = vmin.f32 %v458_v8, 1e+30  ;;  %v591_v61 = vpop.xlane.xlu0 %590 }
  0xee   : > { %v412_v9 = vpop.f32.mrf.mxu0  ;;  %v460_v10 = vpop.f32.mrf.mxu1 }
  0xef   : > { %v511_v19 = vmin.f32 %v495_v14, %v412_v9  ;;  %v519_v25 = vmin.f32 %v503_v20, %v460_v10  ;;  %v588_v3 = vpop.xlane.xlu1 %587 }
  0xf0   : > { %v416_v15 = vpop.f32.mrf.mxu0  ;;  %v464_v16 = vpop.f32.mrf.mxu1 }
  0xf1   : > { %675 = vmin.xlane.f32.xlu1 %v518_v13  ;;  %620 = vadd.xlane.f32.xlu0 %v619_v11  ;;  %v496_v26 = vmin.f32 %v416_v15, 1e+30  ;;  %v504_v31 = vmin.f32 %v464_v16, 1e+30  ;;  %v594_v62 = vpop.xlane.xlu0 %593  ;;  %v737_v11 = vlaneseq }
  0xf2   : > { %v466_v17 = vpop.f32.mrf.mxu1  ;;  %v418_v21 = vpop.f32.mrf.mxu0 }
  0xf3   : > { %v512_v30 = vmin.f32 %v496_v26, %v418_v21  ;;  %v520_v36 = vmin.f32 %v504_v31, %v466_v17  ;;  %v1282_v14 = vand.u32 127, %v737_v11  ;;  %v1284_v16 = vshrl.u32 %v737_v11, 7 }
  0xf4   : > { %v470_v22 = vpop.f32.mrf.mxu1  ;;  %v422_v23 = vpop.f32.mrf.mxu0 }
  0xf5   : > { %661 = vmin.xlane.f32.xlu1 %v511_v19  ;;  %623 = vadd.xlane.f32.xlu0 %v622_v18  ;;  %v497_v37 = vmin.f32 %v422_v23, 1e+30  ;;  %v505_v41 = vmin.f32 %v470_v22, 1e+30  ;;  %v597_v63 = vpop.xlane.xlu0 %596  ;;  %v1287_v17 = vadd.s32 4294967232, %v1282_v14  ;;  %v625_v22 = vmul.f32 0.25, %v579_v59 }
  0xf6   : > { %v472_v24 = vpop.f32.mrf.mxu1  ;;  %v424_v28 = vpop.f32.mrf.mxu0  ;;  %v626_v23 = vmul.f32 0.25, %v582_v60 }
  0xf7   : > { %v513_v40 = vmin.f32 %v497_v37, %v424_v28  ;;  %v521_v43 = vmin.f32 %v505_v41, %v472_v24  ;;  %v795_v20 = vsub.s32 %v1287_v17, %v1284_v16  ;;  %v629_v24 = vmul.f32 0.25, %v591_v61 }
  0xf8   : > { %v476_v27 = vpop.f32.mrf.mxu1  ;;  %v428_v32 = vpop.f32.mrf.mxu0  ;;  %v631_v28 = vmul.f32 0.25, %v597_v63  ;;  %v757_v41 = vadd.s32 4294967272, %v1282_v14  ;;  %v785_v61 = vadd.s32 4294967240, %v1282_v14 }
  0xf9   : > { %677 = vmin.xlane.f32.xlu1 %v519_v25  ;;  %v498_v44 = vmin.f32 %v428_v32, 1e+30  ;;  %v506_v52 = vmin.f32 %v476_v27, 1e+30  ;;  %v600_v0 = vpop.xlane.xlu0 %599  ;;  %v627_v25 = vmul.f32 0.25, %v585_v1  ;;  %v630_v27 = vmul.f32 0.25, %v594_v62 }
  0xfa   : > { %v478_v29 = vpop.f32.mrf.mxu1  ;;  %v430_v39 = vpop.f32.mrf.mxu0  ;;  %v1299_v32 = vadd.s32 4294967224, %v1282_v14 }
  0xfb   : > { %v514_v46 = vmin.f32 %v498_v44, %v430_v39  ;;  %v522_v55 = vmin.f32 %v506_v52, %v478_v29  ;;  %v1295_v29 = vmul.f32 0.25, %v600_v0 }
  0xfc   : > { %v482_v33 = vpop.f32.mrf.mxu1  ;;  %v434_v42 = vpop.f32.mrf.mxu0 }
  0xfd   : > { %663 = vmin.xlane.f32.xlu1 %v512_v30  ;;  %v507_v34 = vmin.f32 %v482_v33, 1e+30  ;;  %v499_v47 = vmin.f32 %v434_v42, 1e+30  ;;  %v603_v2 = vpop.xlane.xlu0 %602  ;;  %v743_v30 = vadd.s32 4294967288, %v1282_v14  ;;  %v750_v33 = vadd.s32 4294967280, %v1282_v14 }
  0xfe   : > { %v484_v35 = vpop.f32.mrf.mxu1  ;;  %v436_v45 = vpop.f32.mrf.mxu0  ;;  %v633_v31 = vmul.f32 0.25, %v603_v2  ;;  %v1313_v42 = vadd.s32 4294967208, %v1282_v14 }
  0xff   : > { %v523_v38 = vmin.f32 %v507_v34, %v484_v35  ;;  %v515_v49 = vmin.f32 %v499_v47, %v436_v45  ;;  %v1303_v34 = vadd.s32 4294967216, %v1282_v14  ;;  %v746_v44 = vsub.s32 %v743_v30, %v1284_v16 }
 0x100   : > { %v440_v48 = vpop.f32.mrf.mxu0  ;;  %v488_v54 = vpop.f32.mrf.mxu1  ;;  %v1320_v47 = vadd.s32 4294967200, %v1282_v14 }
 0x101   : > { %679 = vmin.xlane.f32.xlu1 %v520_v36  ;;  %685 = vmin.xlane.f32.xlu0 %v523_v38  ;;  %v500_v50 = vmin.f32 %v440_v48, 1e+30  ;;  %v508_v56 = vmin.f32 %v488_v54, 1e+30  ;;  %v606_v4 = vpop.xlane.xlu0 %605  ;;  %v628_v38 = vmul.f32 0.25, %v588_v3  ;;  %v809_v52 = vsub.s32 %v1303_v34, %v1284_v16 }
 0x102   : > { %v442_v51 = vpop.f32.mrf.mxu0  ;;  %v490_v57 = vpop.f32.mrf.mxu1  ;;  %v634_v35 = vmul.f32 0.25, %v606_v4  ;;  %v823_v0 = vsub.s32 %v1320_v47, %v1284_v16  ;;  %v1337_v3 = vadd.s32 4294967184, %v1282_v14  ;;  %v1340_v4 = vadd.s32 4294967192, %v1282_v14 }
 0x103   : > { %v516_v53 = vmin.f32 %v500_v50, %v442_v51  ;;  %v524_v58 = vmin.f32 %v508_v56, %v490_v57  ;;  %v753_v50 = vsub.s32 %v750_v33, %v1284_v16  ;;  %v778_v56 = vadd.s32 4294967248, %v1282_v14 }
 0x104   : > { %v760_v57 = vsub.s32 %v757_v41, %v1284_v16  ;;  %v830_v30 = vsub.s32 %v1340_v4, %v1284_v16 }
 0x105   : > { %665 = vmin.xlane.f32.xlu1 %v513_v40  ;;  %v609_v7 = vpop.xlane.xlu0 %608  ;;  %v741_v40 = vsub.s32 %v1282_v14, %v1284_v16 }
 0x106   : > { %v635_v36 = vmul.f32 0.25, %v609_v7 }
 0x109   : > { %681 = vmin.xlane.f32.xlu1 %v521_v43  ;;  %v612_v9 = vpop.xlane.xlu0 %611 }
 0x10a   : > { %v1305_v37 = vmul.f32 0.25, %v612_v9 }
 0x10d   : > { %667 = vmin.xlane.f32.xlu1 %v514_v46  ;;  %v615_v13 = vpop.xlane.xlu0 %614  ;;  %v764_v46 = vadd.s32 4294967264, %v1282_v14 }
 0x10e   : > { %v1307_v39 = vmul.f32 0.25, %v615_v13 }
 0x10f   : > { %v767_v63 = vsub.s32 %v764_v46, %v1284_v16 }
 0x111   : > { %669 = vmin.xlane.f32.xlu1 %v515_v49  ;;  %v802_v49 = vsub.s32 %v1299_v32, %v1284_v16 }
 0x115   : > { %671 = vmin.xlane.f32.xlu1 %v516_v53 }
 0x119   : > { %683 = vmin.xlane.f32.xlu1 %v522_v55  ;;  %v771_v55 = vadd.s32 4294967256, %v1282_v14 }
 0x11b   : > { %v774_v9 = vsub.s32 %v771_v55, %v1284_v16 }
 0x11d   : > { %687 = vmin.xlane.f32.xlu1 %v524_v58  ;;  %v816_v58 = vsub.s32 %v1313_v42, %v1284_v16 }
 0x172   : > { %v1276_v5 = vpop.xlane.xlu1 %673  ;;  %v658_v18 = vpop.xlane.xlu0 %657 }
 0x173   : > { %v689_v53 = vadd.f32 %v658_v18, %v625_v22  ;;  %v788_v18 = vsub.s32 %v785_v61, %v1284_v16 }
 0x176   : > { %v660_v6 = vpop.xlane.xlu1 %659  ;;  %v1293_v21 = vpop.xlane.xlu0 %617 }
 0x177   : > { %v690_v45 = vadd.f32 %v660_v6, %v626_v23  ;;  %v705_v6 = vmax.f32 %v689_v53, 0.0  ;;  %v638_v55 = vmul.f32 0.25, %v1293_v21 }
 0x179   : > { %v706_v62 = vmax.f32 %v690_v45, 0.0  ;;  %v742_v33 = vrot.slane %v705_v6, %v741_v40 }
 0x17a   : > { %v1278_v8 = vpop.xlane.xlu1 %675  ;;  %v621_v48 = vpop.xlane.xlu0 %620 }
 0x17b   : > { %v747_v22 = vrot.slane %v706_v62, %v746_v44 }
 0x17e   : > { %v662_v10 = vpop.xlane.xlu1 %661  ;;  %v624_v11 = vpop.xlane.xlu0 %623 }
 0x17f   : > { %v691_v51 = vadd.f32 %v662_v10, %v627_v25  ;;  %v781_v10 = vsub.s32 %v778_v56, %v1284_v16  ;;  %v697_v25 = vadd.f32 %v1276_v5, %v633_v31  ;;  %v749_v5 = vsel %vm748_vm3, %v747_v22, %v742_v33 }
 0x181   : > { %v707_v2 = vmax.f32 %v691_v51, 0.0  ;;  %v713_v40 = vmax.f32 %v697_v25, 0.0 }
 0x182   : > { %v1280_v12 = vpop.xlane.xlu1 %677 }
 0x183   : > { %v699_v44 = vadd.f32 %v1280_v12, %v635_v36 }
 0x186   : > { %v664_v15 = vpop.xlane.xlu1 %663 }
 0x187   : > { %v692_v54 = vadd.f32 %v664_v15, %v628_v38  ;;  %v698_v38 = vadd.f32 %v1278_v8, %v634_v35 }
 0x189   : > { %v708_v7 = vmax.f32 %v692_v54, 0.0  ;;  %v714_v36 = vmax.f32 %v698_v38, 0.0 }
 0x18a   : > { %v1289_v19 = vpop.xlane.xlu1 %679  ;;  %v686_v54 = vpop.xlane.xlu0 %685 }
 0x18b   : > { %v761_v41 = vrot.slane %v708_v7, %v760_v57  ;;  %v700_v31 = vadd.f32 %v1289_v19, %v1305_v37  ;;  %v715_v57 = vmax.f32 %v699_v44, 0.0 }
 0x18d   : > { %v810_v4 = vrot.slane %v715_v57, %v809_v52 }
 0x18e   : > { %v666_v26 = vpop.xlane.xlu1 %665 }
 0x18f   : > { %v693_v59 = vadd.f32 %v666_v26, %v629_v24  ;;  %v754_v26 = vrot.slane %v707_v2, %v753_v50  ;;  %v640_v2 = vmul.f32 0.25, %v624_v11 }
 0x191   : > { %v709_v13 = vmax.f32 %v693_v59, 0.0  ;;  %v756_v8 = vsel %vm755_vm4, %v754_v26, %v749_v5  ;;  %v841_v59 = vadd.s32 4294967176, %v1282_v14 }
 0x192   : > { %v1315_v43 = vpop.xlane.xlu1 %681 }
 0x193   : > { %v768_v46 = vrot.slane %v709_v13, %v767_v63  ;;  %v701_v12 = vadd.f32 %v1315_v43, %v1307_v39  ;;  %v796_v39 = vrot.slane %v713_v40, %v795_v20  ;;  %v844_v7 = vsub.s32 %v841_v59, %v1284_v16 }
 0x195   : > { %v717_v43 = vmax.f32 %v701_v12, 0.0 }
 0x196   : > { %v668_v60 = vpop.xlane.xlu1 %667 }
 0x197   : > { %v694_v1 = vadd.f32 %v668_v60, %v630_v27  ;;  %v837_v27 = vsub.s32 %v1337_v3, %v1284_v16  ;;  %v716_v60 = vmax.f32 %v700_v31, 0.0  ;;  %v824_v34 = vrot.slane %v717_v43, %v823_v0 }
 0x199   : > { %v710_v23 = vmax.f32 %v694_v1, 0.0  ;;  %v803_v1 = vrot.slane %v714_v36, %v802_v49  ;;  %v817_v32 = vrot.slane %v716_v60, %v816_v58 }
 0x19a   : > { %v670_v15 = vpop.xlane.xlu1 %669 }
 0x19b   : > { %v695_v24 = vadd.f32 %v670_v15, %v631_v28  ;;  %v639_v28 = vmul.f32 0.25, %v621_v48  ;;  %v775_v50 = vrot.slane %v710_v23, %v774_v9  ;;  %v763_v48 = vsel %vm762_vm5, %v761_v41, %v756_v8 }
 0x19c   : > { %v770_v19 = vsel %vm769_vm6, %v768_v46, %v763_v48 }
 0x19d   : > { %v711_v45 = vmax.f32 %v695_v24, 0.0  ;;  %v703_v37 = vadd.f32 %v686_v54, %v639_v28  ;;  %v777_v61 = vsel %vm776_vm7, %v775_v50, %v770_v19 }
 0x19e   : > { %v672_v51 = vpop.xlane.xlu1 %671 }
 0x19f   : > { %v696_v53 = vadd.f32 %v672_v51, %v1295_v29  ;;  %v782_v35 = vrot.slane %v711_v45, %v781_v10  ;;  %v719_v20 = vmax.f32 %v703_v37, 0.0 }
 0x1a1   : > { %v712_v56 = vmax.f32 %v696_v53, 0.0  ;;  %v784_v21 = vsel %vm783_vm8, %v782_v35, %v777_v61  ;;  %v838_v42 = vrot.slane %v719_v20, %v837_v27 }
 0x1a2   : > { %v684_v29 = vpop.xlane.xlu1 %683 }
 0x1a3   : > { %v789_v62 = vrot.slane %v712_v56, %v788_v18  ;;  %v702_v63 = vadd.f32 %v684_v29, %v638_v55 }
 0x1a5   : > { %v791_v14 = vsel %vm790_vm9, %v789_v62, %v784_v21  ;;  %v718_v3 = vmax.f32 %v702_v63, 0.0 }
 0x1a6   : > { %v798_v17 = vsel %vm797_vm10, %v796_v39, %v791_v14  ;;  %v688_v6 = vpop.xlane.xlu1 %687 }
 0x1a7   : > { %v805_v49 = vsel %vm804_vm11, %v803_v1, %v798_v17  ;;  %v704_v9 = vadd.f32 %v688_v6, %v640_v2  ;;  %v831_v11 = vrot.slane %v718_v3, %v830_v30 }
 0x1a8   : > { %v812_v52 = vsel %vm811_vm12, %v810_v4, %v805_v49 }
 0x1a9   : > { %v819_v10 = vsel %vm818_vm13, %v817_v32, %v812_v52  ;;  %v720_v13 = vmax.f32 %v704_v9, 0.0 }
 0x1aa   : > { %v826_v58 = vsel %vm825_vm14, %v824_v34, %v819_v10 }
 0x1ab   : > { %v833_v16 = vsel %vm832_vm15, %v831_v11, %v826_v58  ;;  %v845_v47 = vrot.slane %v720_v13, %v844_v7 }
 0x1ac   : > { %v840_v0 = vsel %vm839_vm0, %v838_v42, %v833_v16 }
 0x1ad   : > { %v847_v15 = vsel %vm846_vm1, %v845_v47, %v840_v0 }
 0x1ae   : > { %849 = vst [vmem:[%s193_s6] sm:$0x1] %v847_v15 }
 0x1af   : > { %1065 = shalt.err (!%p1062_p5)
}
 0x1b0   : > { %s1066_s25 = scalar_lea.hbm %s1394_s16, 16  ;;  %s1070_s28 = scalar_lea.hbm %s1438_s2, 32 }
 0x1b1   : > { %p1067_p6 = scmp.ne.s32.totalorder %s1394_s16, %s1066_s25  ;;  %p1071_p10 = scmp.lt.s32.totalorder %s1394_s16, %s1438_s2 }
 0x1b2   : > { %p1072_p11 = scmp.lt.s32.totalorder %s1070_s28, %s1066_s25 }
 0x1b3   : > { %p1068_p7 = pnand %p1067_p6, %p1187_p4 }
 0x1b4   : > { %p1073_p12 = por %p1072_p11, %p1071_p10 }
 0x1b5   : > { %p1069_p9 = pneg %p1068_p7 }
 0x1b7   : > { %p1074_p13 = pnand %p1073_p12, %p1069_p9 }
 0x1b9   : > { %1077 = shalt.err (!%p1074_p13)
}
 0x1ba   : > { %996 = dma.vmem_to_hbm [thread:$0]  (%p1187_p4), %s865_s7, 16, %s1394_s16, %s851_s12  }
 0x1bb PF: > { %p1002_p0 = scmp.ge.s32.totalorder %s1128_s14, 2  ;;  %s876_s3 = sand.u32 1, %s1108_s9  }
 0x1bc   : > { %s877_s4 = scalar_lea.sflag [#allocation4], %s876_s3 }
 0x1bd   : > { %p999_p1 = pnand %p1002_p0, %p1194_p8 }
 0x1bf   : > { %p1000_p2 = pneg %p999_p1 }
 0x1c1   : > { %1103 = dma.done.wait (%p1000_p2), %s877_s4, 16  }
 0x1c2   : > { %1105 = vsyncadd (%p1000_p2), %s877_s4, 4294967280  ;;  %s15_s14 = sadd.s32 1, %s1128_s14   ;;  %s1441_s9 = smov %s1112_s10 }
 0x1c3   : > { %p12_p3 = scmp.ge.s32.totalorder %s15_s14, 4   ;;  %s1442_s10 = smov %s1116_s11 }
 0x1c4   : > { %s1443_s11 = smov %s1200_s22  ;;  %s1444_s12 = smov %s1124_s13 }
 0x1c5   : > { %s1445_s13 = smov %s1447_s17  ;;  %14 = sbr.rel (!%p12_p3) target bundleno = 4 (0x4), region = 74 }
 0x1ca   :  { %881 = vsyncpa [#allocation4], 1 }
 0x1cb   :  { %883 = vsyncpa [#allocation4 + $0x1], 1 }

</bundles_post_ra>
